<compile_context>
chip_gen: v5e
topology: v5e:2x2
jax: 0.10.0
libtpu: 0.0.40
codegen_flags: <defaults>
</compile_context>

<pallas_src>
import math

import jax
import jax.numpy as jnp
from jax import lax
from jax.experimental import pallas as pl
from jax.experimental.pallas import tpu as pltpu


# ---------------------------------------------------------------------------
# Kernels
# ---------------------------------------------------------------------------

def _binarize_transpose_kernel(w_ref, o_ref):
    # w_ref: (tn, tk) f32 raw weights -> o_ref: (tk, tn) int8 in {-1, +1}.
    # The transpose is paid once per weight element (XLU), never per M block.
    s = jnp.where(w_ref[...] >= 0, 1.0, -1.0)        # f32 +/-1, sign(0) -> +1
    o_ref[...] = s.T.astype(jnp.int8)


def _binlin_prebin_kernel(x_ref, wt_ref, b_ref, o_ref, acc_ref):
    # x_ref: (tm, tk) bf16   wt_ref: (tk, tn) int8 (+/-1, pre-transposed)
    # b_ref: (1, tn)  f32    o_ref: (tm, tn)       acc_ref: (tm, tn) f32
    k = pl.program_id(2)

    @pl.when(k == 0)
    def _():
        acc_ref[...] = jnp.zeros_like(acc_ref)

    w = wt_ref[...].astype(jnp.bfloat16)              # int8 -> bf16 (VPU filler)
    acc_ref[...] += jnp.dot(x_ref[...], w, preferred_element_type=jnp.float32)

    @pl.when(k == pl.num_programs(2) - 1)
    def _():
        o_ref[...] = (acc_ref[...] + b_ref[...]).astype(o_ref.dtype)


def _binlin_fused_kernel(x_ref, w_ref, b_ref, o_ref, acc_ref):
    # Small-batch path: binarize the f32 W tile in-kernel (no separate pass).
    # x_ref: (tm, tk) bf16   w_ref: (tn, tk) f32 raw weights
    k = pl.program_id(2)

    @pl.when(k == 0)
    def _():
        acc_ref[...] = jnp.zeros_like(acc_ref)

    w = jnp.where(w_ref[...] >= 0, 1.0, -1.0).astype(jnp.bfloat16)
    acc_ref[...] += lax.dot_general(
        x_ref[...], w,
        dimension_numbers=(((1,), (1,)), ((), ())),    # contract last dims (x @ W.T)
        preferred_element_type=jnp.float32)

    @pl.when(k == pl.num_programs(2) - 1)
    def _():
        o_ref[...] = (acc_ref[...] + b_ref[...]).astype(o_ref.dtype)


# ---------------------------------------------------------------------------
# Tile selection helpers
# ---------------------------------------------------------------------------

def _round_up(x, m):
    return (x + m - 1) // m * m


def _pick_tile(dim, cap, unit, max_waste=0.125):
    """Largest multiple of `unit` <= cap whose padding waste on `dim` is small."""
    dim = _round_up(dim, unit)
    cap = max(unit, min(cap, dim))
    best = unit
    t = unit
    while t <= cap:
        if _round_up(dim, t) - dim <= max_waste * dim:
            best = t
        t += unit
    return best


def _pick_nk_tiles(N, K, *, tn_cap=512, tk_cap=1024):
    Np0 = _round_up(N, 128)
    Kp0 = _round_up(K, 128)
    tn = _pick_tile(Np0, tn_cap, 128)
    # v7x megacore: keep >=2 N blocks when possible so both TensorCores get
    # work even when the batch fits in a single M block (harmless on v5e/v6e).
    if Np0 >= 256 and _round_up(Np0, tn) // tn < 2:
        tn = _pick_tile(Np0, Np0 // 2, 128)
    tk = _pick_tile(Kp0, tk_cap, 128)
    Np = _round_up(Np0, tn)
    Kp = _round_up(Kp0, tk)
    return tn, tk, Np, Kp


def _pick_m_tile(M, *, tm_cap=512):
    Mp0 = _round_up(M, 16)            # bf16 sublane packing granule
    tm = _pick_tile(Mp0, tm_cap, 16)
    Mp = _round_up(Mp0, tm)
    return tm, Mp


# ---------------------------------------------------------------------------
# Wrappers
# ---------------------------------------------------------------------------

def binarize_weight(weight):
    """One-time pass: sign(W) (0 -> +1) stored transposed as int8 of shape (Kp, Np)."""
    N, K = weight.shape
    tn, tk, Np, Kp = _pick_nk_tiles(N, K)
    w_p = weight.astype(jnp.float32)
    if Np != N or Kp != K:
        # Padded rows/cols binarize to +1 but always multiply zero-padded x
        # columns (K) or are sliced off (N), so the padding is numerically inert.
        w_p = jnp.pad(w_p, ((0, Np - N), (0, Kp - K)))

    return pl.pallas_call(
        _binarize_transpose_kernel,
        out_shape=jax.ShapeDtypeStruct((Kp, Np), jnp.int8),
        grid_spec=pltpu.PrefetchScalarGridSpec(
            num_scalar_prefetch=0,
            grid=(Np // tn, Kp // tk),
            in_specs=[pl.BlockSpec((tn, tk), lambda i, j: (i, j))],
            out_specs=pl.BlockSpec((tk, tn), lambda i, j: (j, i)),
        ),
        compiler_params=pltpu.CompilerParams(
            dimension_semantics=("parallel", "parallel")),
    )(w_p)


def binary_linear(x, weight, bias=None, *, w_bin_t=None):
    """Pallas implementation of BinaryLinear.forward: x @ sign(W).T + b.

    x:       [..., in_features]
    weight:  [out_features, in_features] (f32; binarized to +/-1)
    bias:    [out_features] or None
    w_bin_t: optional pre-binarized transposed weight from binarize_weight()
             (int8, shape (Kp, Np)) -- use for frozen inference weights.
    """
    orig_shape = x.shape
    if x.ndim != 2:
        x = x.reshape(-1, orig_shape[-1])
    M, K = x.shape
    N, K2 = weight.shape
    assert K == K2, (x.shape, weight.shape)

    tn, tk, Np, Kp = _pick_nk_tiles(N, K)
    tm, Mp = _pick_m_tile(M)
    n_mblk = Mp // tm
    grid = (n_mblk, Np // tn, Kp // tk)

    # Pad (zeros) + cast activations to bf16 once in the wrapper.
    x_p = jnp.pad(x, ((0, Mp - M), (0, Kp - K))).astype(jnp.bfloat16)
    if bias is None:
        b_p = jnp.zeros((1, Np), jnp.float32)
    else:
        b_p = jnp.pad(bias.astype(jnp.float32), (0, Np - N)).reshape(1, Np)

    if w_bin_t is None and n_mblk <= 2:
        # Small-batch: fuse binarization into the matmul (4 B/weight per M
        # block beats the 6 B/weight of a separate binarize pass).
        w_arg = weight.astype(jnp.float32)
        if Np != N or Kp != K:
            w_arg = jnp.pad(w_arg, ((0, Np - N), (0, Kp - K)))
        kernel = _binlin_fused_kernel
        w_spec = pl.BlockSpec((tn, tk), lambda i, j, k: (j, k))
    else:
        if w_bin_t is None:
            w_bin_t = binarize_weight(weight)
        assert w_bin_t.shape == (Kp, Np) and w_bin_t.dtype == jnp.int8, \
            (w_bin_t.shape, w_bin_t.dtype, (Kp, Np))
        w_arg = w_bin_t
        kernel = _binlin_prebin_kernel
        w_spec = pl.BlockSpec((tk, tn), lambda i, j, k: (k, j))

    out_p = pl.pallas_call(
        kernel,
        out_shape=jax.ShapeDtypeStruct((Mp, Np), x.dtype),
        grid_spec=pltpu.PrefetchScalarGridSpec(
            num_scalar_prefetch=0,
            grid=grid,
            in_specs=[
                pl.BlockSpec((tm, tk), lambda i, j, k: (i, k)),   # x tile
                w_spec,                                           # weight tile
                pl.BlockSpec((1, tn), lambda i, j, k: (0, j)),    # bias tile
            ],
            out_specs=pl.BlockSpec((tm, tn), lambda i, j, k: (i, j)),
            scratch_shapes=[pltpu.VMEM((tm, tn), jnp.float32)],
        ),
        compiler_params=pltpu.CompilerParams(
            dimension_semantics=("parallel", "parallel", "arbitrary")),
    )(x_p, w_arg, b_p)

    out = out_p[:M, :N]
    if len(orig_shape) != 2:
        out = out.reshape(*orig_shape[:-1], N)
    return out


# ---------------------------------------------------------------------------
# Module mirror
# ---------------------------------------------------------------------------

class BinaryLinear:
    """JAX mirror of the PyTorch BinaryLinear module (forward only)."""

    def __init__(self, in_features, out_features, bias=True, *, key):
        self.in_features = in_features
        self.out_features = out_features
        # reset_parameters(): weight ~ N(0, sqrt(1/in_features)), bias = 0
        self.weight = (jax.random.normal(key, (out_features, in_features),
                                         dtype=jnp.float32)
                       * math.sqrt(1.0 / in_features))
        self.bias = jnp.zeros((out_features,), dtype=jnp.float32) if bias else None
        # Hoisted: binarize + transpose + int8-pack the frozen weight once at
        # construction, so forward() streams only 1 B/weight from HBM.
        self.w_bin_t = binarize_weight(self.weight)
        # TODO(synk): training-time backward (straight-through estimator) is
        # not implemented; this mirrors the inference forward pass only.

    def __call__(self, x):
        return binary_linear(x, self.weight, self.bias, w_bin_t=self.w_bin_t)

    def __repr__(self):
        return f"BinaryLinear ({self.in_features} -> {self.out_features})"


# ---------------------------------------------------------------------------
# Demo / self-check
# ---------------------------------------------------------------------------

def _reference(x, weight, bias):
    # Reference uses the same bf16-quantized activations the kernel consumes
    # (+/-1 weights are exact), so only f32 accumulation order differs.
    xb = x.astype(jnp.bfloat16).astype(jnp.float32)
    w_sign = jnp.where(weight >= 0, 1.0, -1.0)
    out = xb @ w_sign.T
    if bias is not None:
        out = out + bias
    return out


if __name__ == "__main__":
    key = jax.random.PRNGKey(0)
    k_w, k_b, k_x, k_w2, k_x2 = jax.random.split(key, 5)

    # Case 1: module path (int8 sign-weights hoisted at construction),
    # non-aligned shapes, nonzero bias.
    batch, in_features, out_features = 4, 160, 96
    module = BinaryLinear(in_features, out_features, bias=True, key=k_w)
    module.bias = jax.random.normal(k_b, (out_features,), dtype=jnp.float32)
    x = jax.random.normal(k_x, (batch, in_features), dtype=jnp.float32)

    out = jax.block_until_ready(module(x))
    ref = _reference(x, module.weight, module.bias)
    assert out.shape == (batch, out_features)
    assert jnp.allclose(out, ref, atol=1e-2, rtol=1e-3), \
        float(jnp.max(jnp.abs(out - ref)))

    # Case 2: functional small-batch path (fused binarize+matmul kernel),
    # multi-block N and K grid -> exercises K accumulation + N/K padding.
    batch2, in2, out2 = 8, 1100, 380
    w2 = (jax.random.normal(k_w2, (out2, in2), dtype=jnp.float32)
          * math.sqrt(1.0 / in2))
    x2 = jax.random.normal(k_x2, (batch2, in2), dtype=jnp.float32)

    out2_v = jax.block_until_ready(binary_linear(x2, w2, None))
    ref2 = _reference(x2, w2, None)
    assert out2_v.shape == (batch2, out2)
    assert jnp.allclose(out2_v, ref2, atol=2e-2, rtol=5e-3), \
        float(jnp.max(jnp.abs(out2_v - ref2)))

    print("KERNEL_OK")
</pallas_src>

<mosaic_0001>
module attributes {stable_mosaic.version = 11 : i64} {
  func.func @_binarize_transpose_kernel(%arg0: i32, %arg1: i32, %arg2: memref<128x256xf32, #tpu.memory_space<vmem>>, %arg3: memref<256x128xi8, #tpu.memory_space<vmem>>) attributes {dimension_semantics = [#tpu.dimension_semantics<parallel>, #tpu.dimension_semantics<parallel>], iteration_bounds = array<i64: 1, 1>, scalar_prefetch = 0 : i64, scratch_operands = 0 : i64, tpu.core_type = #tpu.core_type<tc>, window_params = [{transform_indices = @transform_0, window_bounds = array<i64: 128, 256>}, {transform_indices = @transform_1, window_bounds = array<i64: 256, 128>}]} {
    %c0 = arith.constant 0 : index
    %c0_0 = arith.constant 0 : index
    %0 = vector.load %arg2[%c0, %c0_0] : memref<128x256xf32, #tpu.memory_space<vmem>>, vector<128x256xf32>
    %cst = arith.constant 0.000000e+00 : f32
    %1 = vector.broadcast %cst : f32 to vector<128x256xf32>
    %2 = arith.cmpf oge, %0, %1 : vector<128x256xf32>
    %cst_1 = arith.constant 1.000000e+00 : f32
    %cst_2 = arith.constant -1.000000e+00 : f32
    %3 = vector.broadcast %cst_1 : f32 to vector<128x256xf32>
    %4 = vector.broadcast %cst_2 : f32 to vector<128x256xf32>
    %5 = arith.select %2, %3, %4 : vector<128x256xi1>, vector<128x256xf32>
    %6 = tpu.transpose %5, [1, 0] : vector<128x256xf32> -> vector<256x128xf32>
    %7 = arith.fptosi %6 : vector<256x128xf32> to vector<256x128xi8>
    %c0_3 = arith.constant 0 : index
    %c0_4 = arith.constant 0 : index
    %8 = vector.load %arg3[%c0_3, %c0_4] : memref<256x128xi8, #tpu.memory_space<vmem>>, vector<256x128xi8>
    tpu.vector_store %arg3[%c0_3, %c0_4], %7 {strides = array<i32>} : memref<256x128xi8, #tpu.memory_space<vmem>>, vector<256x128xi8>,
    return
  }
  func.func @transform_0(%arg0: i32, %arg1: i32) -> (i32, i32) {
    %c0_i32 = arith.constant 0 : i32
    return %arg0, %arg1 : i32, i32
  }
  func.func @transform_1(%arg0: i32, %arg1: i32) -> (i32, i32) {
    %c0_i32 = arith.constant 0 : i32
    return %arg1, %arg0 : i32, i32
  }
}

</mosaic_0001>

<bundles_post_ra>
// kernel: tpu_custom_call.1
= control target key start
LH: loop header
LB: loop body
LE: loop exit
PB: predicated region body
PF: predicated region fallthrough
CT: control target
= control target key end

     0   :  { %6 = vsyncpa [#allocation3], 0  ;;  %s730_s0 = inlined_call_operand.hbm [shape: f32[128,256], index: 0, kind: input, shape index: {}]   ;;  %s731_s1 = inlined_call_operand.hbm [shape: s8[256,128], index: 1, kind: output, shape index: {}]  }
   0x1   :  { %7 = vsyncpa [#allocation4], 0  ;;  %s12_s8 = sshll.u32 %s730_s0, 4  ;;  %s663_s9 = smov [#allocation2]   ;;  %s13_s8 = int_to_ptr.hbm [resolvable:$true] %s12_s8 }
   0x2   :  { %s14_s10 = sshll.u32 %s663_s9, 4  ;;  %s664_s11 = smov 256   ;;  %s15_s10 = int_to_ptr.vmem [resolvable:$true] %s14_s10 }
   0x3   :  { %s665_s12 = smov 16  }
   0x4   :  { %20 = dma.hbm_to_vmem [thread:$0]  %s13_s8, 4096, %s15_s10, [#allocation3], %s664_s11, %s664_s11, %s665_s12  }
   0x5   :  { %659 = dma.done.wait [#allocation3], 4096  }
   0x6   :  { %660 = vsyncadd [#allocation3], 4294963200  ;;  %v25_v0 = vld [vmem:[#allocation2] sm:$0xff]  ;;  %v26_v1 = vld [vmem:[#allocation2 + $0x8] sm:$0xff]  ;;  %v666_v4 = vmov -1.0   ;;  %s667_s0 = smov [#allocation5]  }
   0x7   :  { %v27_v2 = vld [vmem:[#allocation2 + $0x10] sm:$0xff]  ;;  %vm57_vm0 = vcmp.ge.f32.partialorder %v25_v0, 0.0  ;;  %vm58_vm1 = vcmp.ge.f32.partialorder %v26_v1, 0.0  ;;  %v28_v3 = vld [vmem:[#allocation2 + $0x18] sm:$0xff]  ;;  %v29_v10 = vld [vmem:[#allocation2 + $0x20] sm:$0xff]  ;;  %s317_s13 = sshll.u32 %s667_s0, 4  ;;  %s318_s13 = int_to_ptr.vmem [resolvable:$true] %s317_s13 }
   0x8   :  { %v89_v5 = vsel %vm57_vm0, 1.0, %v666_v4  ;;  %v90_v6 = vsel %vm58_vm1, 1.0, %v666_v4  ;;  %vm59_vm2 = vcmp.ge.f32.partialorder %v27_v2, 0.0  ;;  %vm60_vm3 = vcmp.ge.f32.partialorder %v28_v3, 0.0  ;;  %v30_v11 = vld [vmem:[#allocation2 + $0x28] sm:$0xff]  ;;  %v31_v15 = vld [vmem:[#allocation2 + $0x30] sm:$0xff] }
   0x9   :  { %v499_v7 = vpack.i.bf16 %v90_v6, %v89_v5  ;;  %v91_v8 = vsel %vm59_vm2, 1.0, %v666_v4  ;;  %v92_v9 = vsel %vm60_vm3, 1.0, %v666_v4  ;;  %vm61_vm4 = vcmp.ge.f32.partialorder %v29_v10, 0.0  ;;  %v32_v16 = vld [vmem:[#allocation2 + $0x38] sm:$0xff]  ;;  %v33_v20 = vld [vmem:[#allocation2 + $0x40] sm:$0xff]  ;;  %v34_v21 = vld [vmem:[#allocation2 + $0x48] sm:$0xff] }
   0xa   :  { %v501_v12 = vpack.i.bf16 %v92_v9, %v91_v8  ;;  %vm62_vm5 = vcmp.ge.f32.partialorder %v30_v11, 0.0  ;;  %v93_v13 = vsel %vm61_vm4, 1.0, %v666_v4  ;;  %vm63_vm6 = vcmp.ge.f32.partialorder %v31_v15, 0.0  ;;  %v35_v25 = vld [vmem:[#allocation2 + $0x50] sm:$0xff]  ;;  %v36_v26 = vld [vmem:[#allocation2 + $0x58] sm:$0xff]  ;;  %v37_v30 = vld [vmem:[#allocation2 + $0x60] sm:$0xff] }
   0xb   :  { %500 = vxpose.xlu0.b32.start [1/16] %v499_v7, 128  ;;  %v94_v14 = vsel %vm62_vm5, 1.0, %v666_v4  ;;  %vm64_vm7 = vcmp.ge.f32.partialorder %v32_v16, 0.0  ;;  %v95_v18 = vsel %vm63_vm6, 1.0, %v666_v4  ;;  %vm65_vm8 = vcmp.ge.f32.partialorder %v33_v20, 0.0  ;;  %v38_v31 = vld [vmem:[#allocation2 + $0x68] sm:$0xff]  ;;  %v39_v35 = vld [vmem:[#allocation2 + $0x70] sm:$0xff] }
   0xc   :  { %v503_v17 = vpack.i.bf16 %v94_v14, %v93_v13  ;;  %v96_v19 = vsel %vm64_vm7, 1.0, %v666_v4  ;;  %vm66_vm9 = vcmp.ge.f32.partialorder %v34_v21, 0.0  ;;  %v97_v23 = vsel %vm65_vm8, 1.0, %v666_v4  ;;  %v40_v36 = vld [vmem:[#allocation2 + $0x78] sm:$0xff]  ;;  %v41_v40 = vld [vmem:[#allocation2 + $0x80] sm:$0xff]  ;;  %v42_v41 = vld [vmem:[#allocation2 + $0x88] sm:$0xff] }
   0xd   :  { %v505_v22 = vpack.i.bf16 %v96_v19, %v95_v18  ;;  %v98_v24 = vsel %vm66_vm9, 1.0, %v666_v4  ;;  %vm67_vm10 = vcmp.ge.f32.partialorder %v35_v25, 0.0  ;;  %vm68_vm11 = vcmp.ge.f32.partialorder %v36_v26, 0.0  ;;  %v43_v45 = vld [vmem:[#allocation2 + $0x90] sm:$0xff]  ;;  %v44_v46 = vld [vmem:[#allocation2 + $0x98] sm:$0xff]  ;;  %v45_v50 = vld [vmem:[#allocation2 + $0xa0] sm:$0xff] }
   0xe   :  { %v507_v27 = vpack.i.bf16 %v98_v24, %v97_v23  ;;  %v99_v28 = vsel %vm67_vm10, 1.0, %v666_v4  ;;  %v100_v29 = vsel %vm68_vm11, 1.0, %v666_v4  ;;  %vm69_vm12 = vcmp.ge.f32.partialorder %v37_v30, 0.0  ;;  %v46_v51 = vld [vmem:[#allocation2 + $0xa8] sm:$0xff]  ;;  %v47_v55 = vld [vmem:[#allocation2 + $0xb0] sm:$0xff]  ;;  %v48_v56 = vld [vmem:[#allocation2 + $0xb8] sm:$0xff] }
   0xf   :  { %v509_v32 = vpack.i.bf16 %v100_v29, %v99_v28  ;;  %vm70_vm13 = vcmp.ge.f32.partialorder %v38_v31, 0.0  ;;  %v101_v33 = vsel %vm69_vm12, 1.0, %v666_v4  ;;  %vm71_vm14 = vcmp.ge.f32.partialorder %v39_v35, 0.0  ;;  %v49_v60 = vld [vmem:[#allocation2 + $0xc0] sm:$0xff]  ;;  %v50_v61 = vld [vmem:[#allocation2 + $0xc8] sm:$0xff]  ;;  %v51_v1 = vld [vmem:[#allocation2 + $0xd0] sm:$0xff] }
  0x10   :  { %v102_v34 = vsel %vm70_vm13, 1.0, %v666_v4  ;;  %vm72_vm15 = vcmp.ge.f32.partialorder %v40_v36, 0.0  ;;  %v103_v38 = vsel %vm71_vm14, 1.0, %v666_v4  ;;  %vm73_vm0 = vcmp.ge.f32.partialorder %v41_v40, 0.0  ;;  %v52_v2 = vld [vmem:[#allocation2 + $0xd8] sm:$0xff]  ;;  %v53_v7 = vld [vmem:[#allocation2 + $0xe0] sm:$0xff] }
  0x11   :  { %v511_v37 = vpack.i.bf16 %v102_v34, %v101_v33  ;;  %v104_v39 = vsel %vm72_vm15, 1.0, %v666_v4  ;;  %vm74_vm1 = vcmp.ge.f32.partialorder %v42_v41, 0.0  ;;  %v105_v43 = vsel %vm73_vm0, 1.0, %v666_v4  ;;  %v54_v8 = vld [vmem:[#allocation2 + $0xe8] sm:$0xff]  ;;  %v56_v13 = vld [vmem:[#allocation2 + $0xf8] sm:$0xff]  ;;  %s319_s16 = sshll.u32 %s731_s1, 4  ;;  %s320_s16 = int_to_ptr.hbm [resolvable:$true] %s319_s16 }
  0x12   :  { %v513_v42 = vpack.i.bf16 %v104_v39, %v103_v38  ;;  %v106_v44 = vsel %vm74_vm1, 1.0, %v666_v4  ;;  %vm75_vm2 = vcmp.ge.f32.partialorder %v43_v45, 0.0  ;;  %vm76_vm3 = vcmp.ge.f32.partialorder %v44_v46, 0.0  ;;  %s668_s17 = smov 128   ;;  %s669_s18 = smov 8  }
  0x13   :  { %502 = vxpose.xlu0.b32.cont [2/16] %v501_v12, 128  ;;  %v515_v47 = vpack.i.bf16 %v106_v44, %v105_v43  ;;  %v107_v48 = vsel %vm75_vm2, 1.0, %v666_v4  ;;  %v108_v49 = vsel %vm76_vm3, 1.0, %v666_v4  ;;  %vm77_vm4 = vcmp.ge.f32.partialorder %v45_v50, 0.0  ;;  %v55_v12 = vld [vmem:[#allocation2 + $0xf0] sm:$0xff] }
  0x14   :  { %v517_v52 = vpack.i.bf16 %v108_v49, %v107_v48  ;;  %vm78_vm5 = vcmp.ge.f32.partialorder %v46_v51, 0.0  ;;  %v109_v53 = vsel %vm77_vm4, 1.0, %v666_v4  ;;  %vm79_vm6 = vcmp.ge.f32.partialorder %v47_v55, 0.0 }
  0x15   :  { %v110_v54 = vsel %vm78_vm5, 1.0, %v666_v4  ;;  %vm80_vm7 = vcmp.ge.f32.partialorder %v48_v56, 0.0  ;;  %v111_v58 = vsel %vm79_vm6, 1.0, %v666_v4  ;;  %vm81_vm8 = vcmp.ge.f32.partialorder %v49_v60, 0.0 }
  0x16   :  { %v519_v57 = vpack.i.bf16 %v110_v54, %v109_v53  ;;  %v112_v59 = vsel %vm80_vm7, 1.0, %v666_v4  ;;  %vm82_vm9 = vcmp.ge.f32.partialorder %v50_v61, 0.0  ;;  %v113_v63 = vsel %vm81_vm8, 1.0, %v666_v4 }
  0x17   :  { %v521_v62 = vpack.i.bf16 %v112_v59, %v111_v58  ;;  %v114_v0 = vsel %vm82_vm9, 1.0, %v666_v4  ;;  %vm83_vm10 = vcmp.ge.f32.partialorder %v51_v1, 0.0  ;;  %vm84_vm11 = vcmp.ge.f32.partialorder %v52_v2, 0.0 }
  0x18   :  { %v523_v3 = vpack.i.bf16 %v114_v0, %v113_v63  ;;  %v115_v5 = vsel %vm83_vm10, 1.0, %v666_v4  ;;  %v116_v6 = vsel %vm84_vm11, 1.0, %v666_v4  ;;  %vm85_vm12 = vcmp.ge.f32.partialorder %v53_v7, 0.0 }
  0x19   :  { %v525_v9 = vpack.i.bf16 %v116_v6, %v115_v5  ;;  %vm86_vm13 = vcmp.ge.f32.partialorder %v54_v8, 0.0  ;;  %v117_v10 = vsel %vm85_vm12, 1.0, %v666_v4  ;;  %vm87_vm14 = vcmp.ge.f32.partialorder %v55_v12, 0.0 }
  0x1a   :  { %v118_v11 = vsel %vm86_vm13, 1.0, %v666_v4  ;;  %vm88_vm15 = vcmp.ge.f32.partialorder %v56_v13, 0.0  ;;  %v119_v15 = vsel %vm87_vm14, 1.0, %v666_v4 }
  0x1b   :  { %504 = vxpose.xlu0.b32.cont [3/16] %v503_v17, 128  ;;  %v527_v14 = vpack.i.bf16 %v118_v11, %v117_v10  ;;  %v120_v16 = vsel %vm88_vm15, 1.0, %v666_v4 }
  0x1c   :  { %v529_v17 = vpack.i.bf16 %v120_v16, %v119_v15 }
  0x23   :  { %506 = vxpose.xlu0.b32.cont [4/16] %v505_v22, 128 }
  0x2b   :  { %508 = vxpose.xlu0.b32.cont [5/16] %v507_v27, 128 }
  0x33   :  { %510 = vxpose.xlu0.b32.cont [6/16] %v509_v32, 128 }
  0x3b   :  { %512 = vxpose.xlu0.b32.cont [7/16] %v511_v37, 128 }
  0x43   :  { %514 = vxpose.xlu0.b32.cont [8/16] %v513_v42, 128 }
  0x4b   :  { %516 = vxpose.xlu0.b32.cont [9/16] %v515_v47, 128 }
  0x53   :  { %518 = vxpose.xlu0.b32.cont [10/16] %v517_v52, 128 }
  0x5b   :  { %520 = vxpose.xlu0.b32.cont [11/16] %v519_v57, 128 }
  0x63   :  { %522 = vxpose.xlu0.b32.cont [12/16] %v521_v62, 128 }
  0x6b   :  { %524 = vxpose.xlu0.b32.cont [13/16] %v523_v3, 128 }
  0x73   :  { %526 = vxpose.xlu0.b32.cont [14/16] %v525_v9, 128 }
  0x7b   :  { %528 = vxpose.xlu0.b32.cont [15/16] %v527_v14, 128 }
  0x83   :  { %530 = vxpose.xlu0.b32.end [16/16] %v529_v17, 128 }
  0xaf   :  { %v531_v18 = vpop.trf.xlu0 }
  0xb0   :  { %v535_v20 = vunpack.i.h.bf16 %v531_v18  ;;  %v532_v22 = vunpack.i.l.bf16 %v531_v18 }
  0xb2   :  { %v201_v23 = vmax.f32 %v535_v20, -128.0  ;;  %v185_v26 = vmax.f32 %v532_v22, -128.0 }
  0xb4   :  { %v233_v29 = vmin.f32 %v201_v23, 127.0  ;;  %v217_v34 = vmin.f32 %v185_v26, 127.0 }
  0xb6   :  { %vm412_vm0 = vcmp.lt.s32.totalorder %v233_v29, 0  ;;  %v413_v35 = vceil.f32 %v233_v29  ;;  %v414_v37 = vfloor.f32 %v233_v29  ;;  %vm332_vm1 = vcmp.lt.s32.totalorder %v217_v34, 0 }
  0xb7   :  { %v536_v19 = vpop.trf.xlu0  ;;  %v333_v41 = vceil.f32 %v217_v34  ;;  %v334_v44 = vfloor.f32 %v217_v34 }
  0xb8   :  { %v540_v21 = vunpack.i.h.bf16 %v536_v19  ;;  %v537_v24 = vunpack.i.l.bf16 %v536_v19  ;;  %v415_v56 = vsel %vm412_vm0, %v413_v35, %v414_v37 }
  0xb9   :  { %v335_v58 = vsel %vm332_vm1, %v333_v41, %v334_v44  ;;  %v416_v8 = vcvt.f32.s32 %v415_v56 }
  0xba   :  { %v202_v25 = vmax.f32 %v540_v21, -128.0  ;;  %v186_v30 = vmax.f32 %v537_v24, -128.0  ;;  %v336_v12 = vcvt.f32.s32 %v335_v58 }
  0xbc   :  { %v234_v32 = vmin.f32 %v202_v25, 127.0  ;;  %v218_v36 = vmin.f32 %v186_v30, 127.0 }
  0xbe   :  { %v418_v38 = vceil.f32 %v234_v32  ;;  %v419_v39 = vfloor.f32 %v234_v32  ;;  %vm417_vm2 = vcmp.lt.s32.totalorder %v234_v32, 0  ;;  %vm337_vm3 = vcmp.lt.s32.totalorder %v218_v36, 0 }
  0xbf   :  { %v541_v27 = vpop.trf.xlu0  ;;  %v338_v46 = vceil.f32 %v218_v36  ;;  %v339_v47 = vfloor.f32 %v218_v36 }
  0xc0   :  { %v545_v28 = vunpack.i.h.bf16 %v541_v27  ;;  %v542_v31 = vunpack.i.l.bf16 %v541_v27  ;;  %v420_v49 = vsel %vm417_vm2, %v418_v38, %v419_v39 }
  0xc1   :  { %v421_v59 = vcvt.f32.s32 %v420_v49  ;;  %v340_v60 = vsel %vm337_vm3, %v338_v46, %v339_v47 }
  0xc2   :  { %v203_v33 = vmax.f32 %v545_v28, -128.0  ;;  %v187_v4 = vmax.f32 %v542_v31, -128.0  ;;  %v341_v6 = vcvt.f32.s32 %v340_v60 }
  0xc3   :  { %v293_v15 = vpack.c.b16 %v421_v59, %v416_v8 }
  0xc4   :  { %v235_v40 = vmin.f32 %v203_v33, 127.0  ;;  %v219_v42 = vmin.f32 %v187_v4, 127.0  ;;  %v281_v17 = vpack.c.b16 %v341_v6, %v336_v12 }
  0xc6   :  { %v423_v50 = vceil.f32 %v235_v40  ;;  %v424_v51 = vfloor.f32 %v235_v40  ;;  %vm422_vm4 = vcmp.lt.s32.totalorder %v235_v40, 0  ;;  %v343_v53 = vceil.f32 %v219_v42 }
  0xc7   :  { %v546_v43 = vpop.trf.xlu0  ;;  %v344_v54 = vfloor.f32 %v219_v42  ;;  %vm342_vm5 = vcmp.lt.s32.totalorder %v219_v42, 0 }
  0xc8   :  { %v550_v45 = vunpack.i.h.bf16 %v546_v43  ;;  %v547_v48 = vunpack.i.l.bf16 %v546_v43  ;;  %v425_v62 = vsel %vm422_vm4, %v423_v50, %v424_v51 }
  0xc9   :  { %v345_v1 = vsel %vm342_vm5, %v343_v53, %v344_v54  ;;  %v426_v9 = vcvt.f32.s32 %v425_v62 }
  0xca   :  { %v204_v52 = vmax.f32 %v550_v45, -128.0  ;;  %v188_v55 = vmax.f32 %v547_v48, -128.0  ;;  %v346_v13 = vcvt.f32.s32 %v345_v1 }
  0xcc   :  { %v236_v57 = vmin.f32 %v204_v52, 127.0  ;;  %v220_v61 = vmin.f32 %v188_v55, 127.0 }
  0xce   :  { %vm427_vm6 = vcmp.lt.s32.totalorder %v236_v57, 0  ;;  %v428_v63 = vceil.f32 %v236_v57  ;;  %v429_v0 = vfloor.f32 %v236_v57  ;;  %vm347_vm7 = vcmp.lt.s32.totalorder %v220_v61, 0 }
  0xcf   :  { %v348_v2 = vceil.f32 %v220_v61  ;;  %v349_v3 = vfloor.f32 %v220_v61  ;;  %v551_v5 = vpop.trf.xlu0 }
  0xd0   :  { %v430_v7 = vsel %vm427_vm6, %v428_v63, %v429_v0  ;;  %v555_v22 = vunpack.i.h.bf16 %v551_v5  ;;  %v552_v24 = vunpack.i.l.bf16 %v551_v5 }
  0xd1   :  { %v431_v10 = vcvt.f32.s32 %v430_v7  ;;  %v350_v11 = vsel %vm347_vm7, %v348_v2, %v349_v3 }
  0xd2   :  { %v351_v14 = vcvt.f32.s32 %v350_v11  ;;  %v205_v25 = vmax.f32 %v555_v22, -128.0  ;;  %v189_v28 = vmax.f32 %v552_v24, -128.0 }
  0xd3   :  { %v294_v16 = vpack.c.b16 %v431_v10, %v426_v9 }
  0xd4   :  { %v282_v18 = vpack.c.b16 %v351_v14, %v346_v13  ;;  %v237_v31 = vmin.f32 %v205_v25, 127.0  ;;  %v221_v35 = vmin.f32 %v189_v28, 127.0 }
  0xd5   :  { %v295_v19 = vpack.c.b8 %v294_v16, %v293_v15 }
  0xd6   :  { %v283_v20 = vpack.c.b8 %v282_v18, %v281_v17  ;;  %vm432_vm8 = vcmp.lt.s32.totalorder %v237_v31, 0  ;;  %v433_v37 = vceil.f32 %v237_v31  ;;  %v434_v39 = vfloor.f32 %v237_v31 }
  0xd7   :  { %309 = vst [vmem:[#allocation5 + $0x20] sm:$0xff] %v295_v19  ;;  %v556_v21 = vpop.trf.xlu0  ;;  %vm352_vm9 = vcmp.lt.s32.totalorder %v221_v35, 0  ;;  %v353_v43 = vceil.f32 %v221_v35  ;;  %v354_v46 = vfloor.f32 %v221_v35 }
  0xd8   :  { %305 = vst [vmem:[#allocation5] sm:$0xff] %v283_v20  ;;  %v560_v23 = vunpack.i.h.bf16 %v556_v21  ;;  %v557_v26 = vunpack.i.l.bf16 %v556_v21  ;;  %v435_v58 = vsel %vm432_vm8, %v433_v37, %v434_v39 }
  0xd9   :  { %v355_v60 = vsel %vm352_vm9, %v353_v43, %v354_v46  ;;  %v436_v10 = vcvt.f32.s32 %v435_v58 }
  0xda   :  { %v206_v27 = vmax.f32 %v560_v23, -128.0  ;;  %v190_v32 = vmax.f32 %v557_v26, -128.0  ;;  %v356_v14 = vcvt.f32.s32 %v355_v60 }
  0xdc   :  { %v238_v34 = vmin.f32 %v206_v27, 127.0  ;;  %v222_v38 = vmin.f32 %v190_v32, 127.0 }
  0xde   :  { %v438_v40 = vceil.f32 %v238_v34  ;;  %v439_v41 = vfloor.f32 %v238_v34  ;;  %vm437_vm10 = vcmp.lt.s32.totalorder %v238_v34, 0  ;;  %vm357_vm11 = vcmp.lt.s32.totalorder %v222_v38, 0 }
  0xdf   :  { %v561_v29 = vpop.trf.xlu0  ;;  %v358_v48 = vceil.f32 %v222_v38  ;;  %v359_v49 = vfloor.f32 %v222_v38 }
  0xe0   :  { %v565_v30 = vunpack.i.h.bf16 %v561_v29  ;;  %v562_v33 = vunpack.i.l.bf16 %v561_v29  ;;  %v440_v51 = vsel %vm437_vm10, %v438_v40, %v439_v41 }
  0xe1   :  { %v441_v61 = vcvt.f32.s32 %v440_v51  ;;  %v360_v62 = vsel %vm357_vm11, %v358_v48, %v359_v49 }
  0xe2   :  { %v207_v4 = vmax.f32 %v565_v30, -128.0  ;;  %v191_v36 = vmax.f32 %v562_v33, -128.0  ;;  %v361_v8 = vcvt.f32.s32 %v360_v62 }
  0xe3   :  { %v296_v17 = vpack.c.b16 %v441_v61, %v436_v10 }
  0xe4   :  { %v239_v42 = vmin.f32 %v207_v4, 127.0  ;;  %v223_v44 = vmin.f32 %v191_v36, 127.0  ;;  %v284_v19 = vpack.c.b16 %v361_v8, %v356_v14 }
  0xe6   :  { %v443_v52 = vceil.f32 %v239_v42  ;;  %v444_v53 = vfloor.f32 %v239_v42  ;;  %vm442_vm12 = vcmp.lt.s32.totalorder %v239_v42, 0  ;;  %v363_v55 = vceil.f32 %v223_v44 }
  0xe7   :  { %v566_v45 = vpop.trf.xlu0  ;;  %v364_v56 = vfloor.f32 %v223_v44  ;;  %vm362_vm13 = vcmp.lt.s32.totalorder %v223_v44, 0 }
  0xe8   :  { %v570_v47 = vunpack.i.h.bf16 %v566_v45  ;;  %v567_v50 = vunpack.i.l.bf16 %v566_v45  ;;  %v445_v0 = vsel %vm442_vm12, %v443_v52, %v444_v53 }
  0xe9   :  { %v365_v3 = vsel %vm362_vm13, %v363_v55, %v364_v56  ;;  %v446_v11 = vcvt.f32.s32 %v445_v0 }
  0xea   :  { %v208_v54 = vmax.f32 %v570_v47, -128.0  ;;  %v192_v57 = vmax.f32 %v567_v50, -128.0  ;;  %v366_v15 = vcvt.f32.s32 %v365_v3 }
  0xec   :  { %v240_v59 = vmin.f32 %v208_v54, 127.0  ;;  %v224_v63 = vmin.f32 %v192_v57, 127.0 }
  0xee   :  { %vm447_vm14 = vcmp.lt.s32.totalorder %v240_v59, 0  ;;  %v448_v1 = vceil.f32 %v240_v59  ;;  %v449_v2 = vfloor.f32 %v240_v59  ;;  %vm367_vm15 = vcmp.lt.s32.totalorder %v224_v63, 0 }
  0xef   :  { %v368_v5 = vceil.f32 %v224_v63  ;;  %v369_v6 = vfloor.f32 %v224_v63  ;;  %v571_v7 = vpop.trf.xlu0 }
  0xf0   :  { %v450_v9 = vsel %vm447_vm14, %v448_v1, %v449_v2  ;;  %v575_v24 = vunpack.i.h.bf16 %v571_v7  ;;  %v572_v26 = vunpack.i.l.bf16 %v571_v7 }
  0xf1   :  { %v451_v12 = vcvt.f32.s32 %v450_v9  ;;  %v370_v13 = vsel %vm367_vm15, %v368_v5, %v369_v6 }
  0xf2   :  { %v371_v16 = vcvt.f32.s32 %v370_v13  ;;  %v209_v27 = vmax.f32 %v575_v24, -128.0  ;;  %v193_v30 = vmax.f32 %v572_v26, -128.0 }
  0xf3   :  { %v297_v18 = vpack.c.b16 %v451_v12, %v446_v11 }
  0xf4   :  { %v285_v20 = vpack.c.b16 %v371_v16, %v366_v15  ;;  %v241_v33 = vmin.f32 %v209_v27, 127.0  ;;  %v225_v37 = vmin.f32 %v193_v30, 127.0 }
  0xf5   :  { %v298_v21 = vpack.c.b8 %v297_v18, %v296_v17 }
  0xf6   :  { %v286_v22 = vpack.c.b8 %v285_v20, %v284_v19  ;;  %vm452_vm0 = vcmp.lt.s32.totalorder %v241_v33, 0  ;;  %v453_v39 = vceil.f32 %v241_v33  ;;  %v454_v41 = vfloor.f32 %v241_v33 }
  0xf7   :  { %310 = vst [vmem:[#allocation5 + $0x28] sm:$0xff] %v298_v21  ;;  %v576_v23 = vpop.trf.xlu0  ;;  %vm372_vm1 = vcmp.lt.s32.totalorder %v225_v37, 0  ;;  %v373_v45 = vceil.f32 %v225_v37  ;;  %v374_v48 = vfloor.f32 %v225_v37 }
  0xf8   :  { %306 = vst [vmem:[#allocation5 + $0x8] sm:$0xff] %v286_v22  ;;  %v580_v25 = vunpack.i.h.bf16 %v576_v23  ;;  %v577_v28 = vunpack.i.l.bf16 %v576_v23  ;;  %v455_v60 = vsel %vm452_vm0, %v453_v39, %v454_v41 }
  0xf9   :  { %v375_v62 = vsel %vm372_vm1, %v373_v45, %v374_v48  ;;  %v456_v12 = vcvt.f32.s32 %v455_v60 }
  0xfa   :  { %v210_v29 = vmax.f32 %v580_v25, -128.0  ;;  %v194_v34 = vmax.f32 %v577_v28, -128.0  ;;  %v376_v16 = vcvt.f32.s32 %v375_v62 }
  0xfc   :  { %v242_v35 = vmin.f32 %v210_v29, 127.0  ;;  %v226_v40 = vmin.f32 %v194_v34, 127.0 }
  0xfe   :  { %v458_v42 = vceil.f32 %v242_v35  ;;  %v459_v43 = vfloor.f32 %v242_v35  ;;  %vm457_vm2 = vcmp.lt.s32.totalorder %v242_v35, 0  ;;  %vm377_vm3 = vcmp.lt.s32.totalorder %v226_v40, 0 }
  0xff   :  { %v581_v31 = vpop.trf.xlu0  ;;  %v378_v50 = vceil.f32 %v226_v40  ;;  %v379_v51 = vfloor.f32 %v226_v40 }
 0x100   :  { %v585_v32 = vunpack.i.h.bf16 %v581_v31  ;;  %v582_v4 = vunpack.i.l.bf16 %v581_v31  ;;  %v460_v53 = vsel %vm457_vm2, %v458_v42, %v459_v43 }
 0x101   :  { %v461_v63 = vcvt.f32.s32 %v460_v53  ;;  %v380_v0 = vsel %vm377_vm3, %v378_v50, %v379_v51 }
 0x102   :  { %v211_v36 = vmax.f32 %v585_v32, -128.0  ;;  %v195_v38 = vmax.f32 %v582_v4, -128.0  ;;  %v381_v10 = vcvt.f32.s32 %v380_v0 }
 0x103   :  { %v299_v19 = vpack.c.b16 %v461_v63, %v456_v12 }
 0x104   :  { %v243_v44 = vmin.f32 %v211_v36, 127.0  ;;  %v227_v46 = vmin.f32 %v195_v38, 127.0  ;;  %v287_v21 = vpack.c.b16 %v381_v10, %v376_v16 }
 0x106   :  { %v463_v54 = vceil.f32 %v243_v44  ;;  %v464_v55 = vfloor.f32 %v243_v44  ;;  %vm462_vm4 = vcmp.lt.s32.totalorder %v243_v44, 0  ;;  %v383_v57 = vceil.f32 %v227_v46 }
 0x107   :  { %v586_v47 = vpop.trf.xlu0  ;;  %v384_v58 = vfloor.f32 %v227_v46  ;;  %vm382_vm5 = vcmp.lt.s32.totalorder %v227_v46, 0 }
 0x108   :  { %v590_v49 = vunpack.i.h.bf16 %v586_v47  ;;  %v587_v52 = vunpack.i.l.bf16 %v586_v47  ;;  %v465_v2 = vsel %vm462_vm4, %v463_v54, %v464_v55 }
 0x109   :  { %v385_v6 = vsel %vm382_vm5, %v383_v57, %v384_v58  ;;  %v466_v13 = vcvt.f32.s32 %v465_v2 }
 0x10a   :  { %v212_v56 = vmax.f32 %v590_v49, -128.0  ;;  %v196_v59 = vmax.f32 %v587_v52, -128.0  ;;  %v386_v17 = vcvt.f32.s32 %v385_v6 }
 0x10c   :  { %v244_v61 = vmin.f32 %v212_v56, 127.0  ;;  %v228_v1 = vmin.f32 %v196_v59, 127.0 }
 0x10e   :  { %vm467_vm6 = vcmp.lt.s32.totalorder %v244_v61, 0  ;;  %v468_v3 = vceil.f32 %v244_v61  ;;  %v469_v5 = vfloor.f32 %v244_v61  ;;  %vm387_vm7 = vcmp.lt.s32.totalorder %v228_v1, 0 }
 0x10f   :  { %v388_v7 = vceil.f32 %v228_v1  ;;  %v389_v8 = vfloor.f32 %v228_v1  ;;  %v591_v9 = vpop.trf.xlu0 }
 0x110   :  { %v470_v11 = vsel %vm467_vm6, %v468_v3, %v469_v5  ;;  %v595_v26 = vunpack.i.h.bf16 %v591_v9  ;;  %v592_v28 = vunpack.i.l.bf16 %v591_v9 }
 0x111   :  { %v471_v14 = vcvt.f32.s32 %v470_v11  ;;  %v390_v15 = vsel %vm387_vm7, %v388_v7, %v389_v8 }
 0x112   :  { %v391_v18 = vcvt.f32.s32 %v390_v15  ;;  %v213_v29 = vmax.f32 %v595_v26, -128.0  ;;  %v197_v32 = vmax.f32 %v592_v28, -128.0 }
 0x113   :  { %v300_v20 = vpack.c.b16 %v471_v14, %v466_v13 }
 0x114   :  { %v288_v22 = vpack.c.b16 %v391_v18, %v386_v17  ;;  %v245_v4 = vmin.f32 %v213_v29, 127.0  ;;  %v229_v39 = vmin.f32 %v197_v32, 127.0 }
 0x115   :  { %v301_v23 = vpack.c.b8 %v300_v20, %v299_v19 }
 0x116   :  { %v289_v24 = vpack.c.b8 %v288_v22, %v287_v21  ;;  %vm472_vm8 = vcmp.lt.s32.totalorder %v245_v4, 0  ;;  %v473_v41 = vceil.f32 %v245_v4  ;;  %v474_v43 = vfloor.f32 %v245_v4 }
 0x117   :  { %311 = vst [vmem:[#allocation5 + $0x30] sm:$0xff] %v301_v23  ;;  %v596_v25 = vpop.trf.xlu0  ;;  %vm392_vm9 = vcmp.lt.s32.totalorder %v229_v39, 0  ;;  %v393_v47 = vceil.f32 %v229_v39  ;;  %v394_v50 = vfloor.f32 %v229_v39 }
 0x118   :  { %307 = vst [vmem:[#allocation5 + $0x10] sm:$0xff] %v289_v24  ;;  %v600_v27 = vunpack.i.h.bf16 %v596_v25  ;;  %v597_v30 = vunpack.i.l.bf16 %v596_v25  ;;  %v475_v62 = vsel %vm472_vm8, %v473_v41, %v474_v43 }
 0x119   :  { %v395_v0 = vsel %vm392_vm9, %v393_v47, %v394_v50  ;;  %v476_v13 = vcvt.f32.s32 %v475_v62 }
 0x11a   :  { %v214_v31 = vmax.f32 %v600_v27, -128.0  ;;  %v198_v35 = vmax.f32 %v597_v30, -128.0  ;;  %v396_v17 = vcvt.f32.s32 %v395_v0 }
 0x11c   :  { %v246_v37 = vmin.f32 %v214_v31, 127.0  ;;  %v230_v42 = vmin.f32 %v198_v35, 127.0 }
 0x11e   :  { %v478_v44 = vceil.f32 %v246_v37  ;;  %v479_v45 = vfloor.f32 %v246_v37  ;;  %vm477_vm10 = vcmp.lt.s32.totalorder %v246_v37, 0  ;;  %vm397_vm11 = vcmp.lt.s32.totalorder %v230_v42, 0 }
 0x11f   :  { %v601_v33 = vpop.trf.xlu0  ;;  %v398_v52 = vceil.f32 %v230_v42  ;;  %v399_v53 = vfloor.f32 %v230_v42 }
 0x120   :  { %v605_v34 = vunpack.i.h.bf16 %v601_v33  ;;  %v602_v36 = vunpack.i.l.bf16 %v601_v33  ;;  %v480_v55 = vsel %vm477_vm10, %v478_v44, %v479_v45 }
 0x121   :  { %v481_v1 = vcvt.f32.s32 %v480_v55  ;;  %v400_v2 = vsel %vm397_vm11, %v398_v52, %v399_v53 }
 0x122   :  { %v215_v38 = vmax.f32 %v605_v34, -128.0  ;;  %v199_v40 = vmax.f32 %v602_v36, -128.0  ;;  %v401_v11 = vcvt.f32.s32 %v400_v2 }
 0x123   :  { %v302_v20 = vpack.c.b16 %v481_v1, %v476_v13 }
 0x124   :  { %v247_v46 = vmin.f32 %v215_v38, 127.0  ;;  %v231_v48 = vmin.f32 %v199_v40, 127.0  ;;  %v290_v22 = vpack.c.b16 %v401_v11, %v396_v17 }
 0x126   :  { %v483_v56 = vceil.f32 %v247_v46  ;;  %v484_v57 = vfloor.f32 %v247_v46  ;;  %vm482_vm12 = vcmp.lt.s32.totalorder %v247_v46, 0  ;;  %v403_v59 = vceil.f32 %v231_v48 }
 0x127   :  { %v606_v49 = vpop.trf.xlu0  ;;  %v404_v60 = vfloor.f32 %v231_v48  ;;  %vm402_vm13 = vcmp.lt.s32.totalorder %v231_v48, 0 }
 0x128   :  { %v610_v51 = vunpack.i.h.bf16 %v606_v49  ;;  %v607_v54 = vunpack.i.l.bf16 %v606_v49  ;;  %v485_v5 = vsel %vm482_vm12, %v483_v56, %v484_v57 }
 0x129   :  { %v405_v8 = vsel %vm402_vm13, %v403_v59, %v404_v60  ;;  %v486_v14 = vcvt.f32.s32 %v485_v5 }
 0x12a   :  { %v216_v58 = vmax.f32 %v610_v51, -128.0  ;;  %v200_v61 = vmax.f32 %v607_v54, -128.0  ;;  %v406_v18 = vcvt.f32.s32 %v405_v8 }
 0x12c   :  { %v248_v63 = vmin.f32 %v216_v58, 127.0  ;;  %v232_v3 = vmin.f32 %v200_v61, 127.0 }
 0x12e   :  { %vm487_vm14 = vcmp.lt.s32.totalorder %v248_v63, 0  ;;  %v488_v6 = vceil.f32 %v248_v63  ;;  %v489_v7 = vfloor.f32 %v248_v63  ;;  %vm407_vm15 = vcmp.lt.s32.totalorder %v232_v3, 0 }
 0x12f   :  { %v408_v9 = vceil.f32 %v232_v3  ;;  %v409_v10 = vfloor.f32 %v232_v3 }
 0x130   :  { %v490_v12 = vsel %vm487_vm14, %v488_v6, %v489_v7 }
 0x131   :  { %v491_v15 = vcvt.f32.s32 %v490_v12  ;;  %v410_v16 = vsel %vm407_vm15, %v408_v9, %v409_v10 }
 0x132   :  { %v411_v19 = vcvt.f32.s32 %v410_v16 }
 0x133   :  { %v303_v21 = vpack.c.b16 %v491_v15, %v486_v14 }
 0x134   :  { %v291_v23 = vpack.c.b16 %v411_v19, %v406_v18 }
 0x135   :  { %v304_v24 = vpack.c.b8 %v303_v21, %v302_v20 }
 0x136   :  { %v292_v25 = vpack.c.b8 %v291_v23, %v290_v22 }
 0x137   :  { %312 = vst [vmem:[#allocation5 + $0x38] sm:$0xff] %v304_v24 }
 0x138   :  { %308 = vst [vmem:[#allocation5 + $0x18] sm:$0xff] %v292_v25 }
 0x139   :  { %325 = dma.vmem_to_hbm [thread:$0]  %s318_s13, 1024, %s320_s16, [#allocation4], %s668_s17, %s668_s17, %s669_s18  }
 0x13a   :  { %661 = dma.done.wait [#allocation4], 1024  }
 0x13b   :  { %662 = vsyncadd [#allocation4], 4294966272 }
 0x13c   :  { %330 = vsyncpa [#allocation3], 1 }
 0x13d   :  { %331 = vsyncpa [#allocation4], 1 }

</bundles_post_ra>
